<compile_context>
chip_gen: v5e
topology: v5e:2x2
jax: 0.10.0
libtpu: 0.0.40
codegen_flags: <defaults>
</compile_context>

<pallas_src>
import numpy as np
import jax
import jax.numpy as jnp
from jax.experimental import pallas as pl
from jax.experimental.pallas import tpu as pltpu

# Fixed module constant B, initialized exactly like the PyTorch module.
_B_NP = np.random.default_rng(seed=123).random((1, 1, 4, 6), dtype=np.float32)
_B_KN = np.ascontiguousarray(_B_NP.reshape(4, 6))   # (K, N) = (4, 6)
_K, _N = _B_KN.shape

_SMALL_M_MAX = 8      # tiny activations go through the SMEM-scalar kernel
_TM_LANE = 512        # rows per lane-axis tile for the batched path


def _tree_sum(terms):
    """Balanced reduction tree (shorter dependent-add chain than a serial fold)."""
    terms = list(terms)
    while len(terms) > 1:
        nxt = [terms[i] + terms[i + 1] for i in range(0, len(terms) - 1, 2)]
        if len(terms) % 2:
            nxt.append(terms[-1])
        terms = nxt
    return terms[0]


# --------------------------- small-M (shipped) path ---------------------------
def _small_compute(a_sref, b, o_ref):
    """o[m, :] = sum_k a_smem[m, k] * b[k, :]  — scalar-splat FMAs, no MXU."""
    m_dim, k_dim = a_sref.shape
    for m in range(m_dim):
        terms = [a_sref[m, k] * b[k:k + 1, :] for k in range(k_dim)]
        o_ref[m:m + 1, :] = _tree_sum(terms).astype(o_ref.dtype)


def _small_kernel_const(a_sref, o_ref):
    # B baked as a trace-time constant: no second operand, no B DMA.
    b = jnp.asarray(_B_KN, dtype=jnp.float32)
    _small_compute(a_sref, b, o_ref)


def _small_kernel_operand(a_sref, b_ref, o_ref):
    # Fallback variant: B as an explicit (tiny) VMEM operand.
    _small_compute(a_sref, b_ref[...], o_ref)


_small_call_cache = {}


def _get_small_matmul(m):
    """Returns fn(a2d: (m, K) f32) -> (m, N) f32 for small m."""
    if m in _small_call_cache:
        return _small_call_cache[m]
    out_shape = jax.ShapeDtypeStruct((m, _N), jnp.float32)
    smem_spec = pl.BlockSpec(memory_space=pltpu.MemorySpace.SMEM)
    vmem_spec = pl.BlockSpec(memory_space=pltpu.MemorySpace.VMEM)

    const_call = pl.pallas_call(
        _small_kernel_const,
        out_shape=out_shape,
        in_specs=[smem_spec],
        out_specs=vmem_spec,
        cost_estimate=pl.CostEstimate(
            flops=2 * m * _K * _N, transcendentals=0,
            bytes_accessed=4 * (m * _K + m * _N)),
    )
    try:
        # One-time eager probe: confirms Mosaic accepts the in-kernel constant.
        jax.block_until_ready(const_call(jnp.zeros((m, _K), jnp.float32)))
        fn = const_call
    except Exception:
        # Mosaic rejected the in-kernel dense constant -> pass B as an operand.
        op_call = pl.pallas_call(
            _small_kernel_operand,
            out_shape=out_shape,
            in_specs=[smem_spec, vmem_spec],
            out_specs=vmem_spec,
            cost_estimate=pl.CostEstimate(
                flops=2 * m * _K * _N, transcendentals=0,
                bytes_accessed=4 * (m * _K + _K * _N + m * _N)),
        )
        b_const = jnp.asarray(_B_KN)
        fn = lambda a2d: op_call(a2d, b_const)
    _small_call_cache[m] = fn
    return fn


# ------------------------- lane-dense batched path ---------------------------
def _batched_kernel(at_ref, ot_ref):
    """A^T tile (K, TM) -> out^T tile (N, TM); rows live on the lane axis.

    B is folded in as 24 Python float (splat) constants, so there is no B
    operand and no dense vector constant to lower."""
    k_dim = at_ref.shape[0]
    n_dim = ot_ref.shape[0]
    rows = [at_ref[k:k + 1, :] for k in range(k_dim)]            # K x (1, TM)
    for n in range(n_dim):
        terms = [float(_B_KN[k, n]) * rows[k] for k in range(k_dim)]
        ot_ref[n:n + 1, :] = _tree_sum(terms).astype(ot_ref.dtype)


def _batched_matmul(a2d):
    """a2d: (Mtot, K) f32 -> (Mtot, N) f32 via lane-dense transposed layout."""
    m_tot = a2d.shape[0]
    tm = min(_TM_LANE, ((m_tot + 127) // 128) * 128)             # lane-aligned
    m_pad = ((m_tot + tm - 1) // tm) * tm
    a_t = jnp.pad(a2d, ((0, m_pad - m_tot), (0, 0))).T           # (K, m_pad)
    out_t = pl.pallas_call(
        _batched_kernel,
        out_shape=jax.ShapeDtypeStruct((_N, m_pad), jnp.float32),
        grid=(m_pad // tm,),
        in_specs=[pl.BlockSpec((_K, tm), lambda i: (0, i),
                               memory_space=pltpu.MemorySpace.VMEM)],
        out_specs=pl.BlockSpec((_N, tm), lambda i: (0, i),
                               memory_space=pltpu.MemorySpace.VMEM),
        compiler_params=pltpu.CompilerParams(
            dimension_semantics=("parallel",)),                  # v7x: 2 TCs
        cost_estimate=pl.CostEstimate(
            flops=2 * m_tot * _K * _N, transcendentals=0,
            bytes_accessed=4 * (m_pad * _K + m_pad * _N)),
    )(a_t)
    return out_t.T[:m_tot]                                       # (Mtot, N)


# --------------------------------- forward ------------------------------------
def net_matmul_forward(x):
    """Replicates torch.matmul(x, B) for x: (..., M, 4) and the fixed module B."""
    assert x.ndim >= 2 and x.shape[-1] == _K, x.shape
    *lead, m, _ = x.shape
    a2d = x.reshape((-1, _K)).astype(jnp.float32)   # fold all leading dims into rows
    m_tot = a2d.shape[0]
    if m_tot <= _SMALL_M_MAX:
        c2d = _get_small_matmul(m_tot)(a2d)
    else:
        c2d = _batched_matmul(a2d)
    return c2d.reshape(tuple(lead) + (m, _N))


if __name__ == "__main__":
    b_full = jnp.asarray(_B_NP)                      # (1, 1, 4, 6) reference

    k1, k2 = jax.random.split(jax.random.PRNGKey(0))
    fwd = jax.jit(net_matmul_forward)

    # Shipped shape of the module: inputs[0] is (1, 1, 1, 4).
    x = jax.random.normal(k1, (1, 1, 1, 4), dtype=jnp.float32)
    out = jax.block_until_ready(fwd(x))
    ref = jnp.matmul(x, b_full)
    assert out.shape == (1, 1, 1, 6), out.shape
    assert jnp.allclose(out, ref, atol=1e-5, rtol=1e-5), "small-M path mismatch"

    # Also exercise the lane-dense batched path (future reuse at batch scale).
    xb = jax.random.normal(k2, (2, 3, 8, 4), dtype=jnp.float32)
    outb = jax.block_until_ready(fwd(xb))
    refb = jnp.matmul(xb, b_full)
    assert outb.shape == (2, 3, 8, 6), outb.shape
    assert jnp.allclose(outb, refb, atol=1e-5, rtol=1e-5), "batched path mismatch"

    print("KERNEL_OK")
</pallas_src>

<mosaic_0001>
module attributes {stable_mosaic.version = 11 : i64} {
  func.func @_small_kernel_operand(%arg0: memref<1x4xf32, #tpu.memory_space<smem>>, %arg1: memref<4x6xf32, #tpu.memory_space<vmem>>, %arg2: memref<1x6xf32, #tpu.memory_space<vmem>>) attributes {dimension_semantics = [], scalar_prefetch = 0 : i64, scratch_operands = 0 : i64, tpu.core_type = #tpu.core_type<tc>} {
    %c0 = arith.constant 0 : index
    %c0_0 = arith.constant 0 : index
    %0 = vector.load %arg1[%c0, %c0_0] : memref<4x6xf32, #tpu.memory_space<vmem>>, vector<4x6xf32>
    %c0_1 = arith.constant 0 : index
    %c0_2 = arith.constant 0 : index
    %1 = memref.load %arg0[%c0_1, %c0_2] : memref<1x4xf32, #tpu.memory_space<smem>>
    %2 = vector.extract_strided_slice %0 {offsets = [0, 0], sizes = [1, 6], strides = [1, 1]} : vector<4x6xf32> to vector<1x6xf32>
    %3 = vector.broadcast %1 : f32 to vector<1x6xf32>
    %4 = arith.mulf %3, %2 : vector<1x6xf32>
    %c0_3 = arith.constant 0 : index
    %c1 = arith.constant 1 : index
    %5 = memref.load %arg0[%c0_3, %c1] : memref<1x4xf32, #tpu.memory_space<smem>>
    %6 = vector.extract_strided_slice %0 {offsets = [1, 0], sizes = [1, 6], strides = [1, 1]} : vector<4x6xf32> to vector<1x6xf32>
    %7 = vector.broadcast %5 : f32 to vector<1x6xf32>
    %8 = arith.mulf %7, %6 : vector<1x6xf32>
    %c0_4 = arith.constant 0 : index
    %c2 = arith.constant 2 : index
    %9 = memref.load %arg0[%c0_4, %c2] : memref<1x4xf32, #tpu.memory_space<smem>>
    %10 = vector.extract_strided_slice %0 {offsets = [2, 0], sizes = [1, 6], strides = [1, 1]} : vector<4x6xf32> to vector<1x6xf32>
    %11 = vector.broadcast %9 : f32 to vector<1x6xf32>
    %12 = arith.mulf %11, %10 : vector<1x6xf32>
    %c0_5 = arith.constant 0 : index
    %c3 = arith.constant 3 : index
    %13 = memref.load %arg0[%c0_5, %c3] : memref<1x4xf32, #tpu.memory_space<smem>>
    %14 = vector.extract_strided_slice %0 {offsets = [3, 0], sizes = [1, 6], strides = [1, 1]} : vector<4x6xf32> to vector<1x6xf32>
    %15 = vector.broadcast %13 : f32 to vector<1x6xf32>
    %16 = arith.mulf %15, %14 : vector<1x6xf32>
    %17 = arith.addf %4, %8 : vector<1x6xf32>
    %18 = arith.addf %12, %16 : vector<1x6xf32>
    %19 = arith.addf %17, %18 : vector<1x6xf32>
    %c0_6 = arith.constant 0 : index
    %c0_7 = arith.constant 0 : index
    %20 = vector.load %arg2[%c0_6, %c0_7] : memref<1x6xf32, #tpu.memory_space<vmem>>, vector<1x6xf32>
    tpu.vector_store %arg2[%c0_6, %c0_7], %19 {strides = array<i32>} : memref<1x6xf32, #tpu.memory_space<vmem>>, vector<1x6xf32>,
    return
  }
}

</mosaic_0001>

<bundles_post_ra>
// kernel: net_matmul_forward.1
= control target key start
LH: loop header
LB: loop body
LE: loop exit
PB: predicated region body
PF: predicated region fallthrough
CT: control target
= control target key end

     0   :  { %7 = vsyncpa [#allocation5], 0  ;;  %s183_s0 = inlined_call_operand.hbm [shape: f32[1,4], index: 0, kind: input, shape index: {}]   ;;  %s184_s1 = inlined_call_operand.hbm [shape: f32[4,6], index: 1, kind: input, shape index: {}]   ;;  %s185_s2 = inlined_call_operand.hbm [shape: f32[1,6], index: 2, kind: output, shape index: {}]  }
   0x1   :  { %8 = vsyncpa [#allocation3], 0 }
   0x2   :  { %9 = vsyncpa [#allocation4], 0  ;;  %s15_s11 = sshll.u32 %s183_s0, 4  ;;  %s24_s14 = sshll.u32 %s184_s1, 4  ;;  %s16_s11 = int_to_ptr.hbm [resolvable:$true] %s15_s11  ;;  %s25_s14 = int_to_ptr.hbm [resolvable:$true] %s24_s14 }
   0x3   :  { %s156_s15 = smov [#allocation2]   ;;  %s157_s16 = smov [#allocation6]  }
   0x4   :  { %18 = dma.hbm_to_smem %s16_s11, 16, %s156_s15, [#allocation5]  }
   0x5   :  { %s26_s17 = sshll.u32 %s157_s16, 4  ;;  %s27_s17 = int_to_ptr.vmem [resolvable:$true] %s26_s17 }
   0x6   :  { %29 = dma.hbm_to_vmem [thread:$0]  %s25_s14, 64, %s27_s17, [#allocation3]  }
   0x7   :  { %150 = dma.done.wait [#allocation5], 16  }
   0x8   :  { %151 = vsyncadd [#allocation5], 4294967280 }
   0x9   :  { %152 = dma.done.wait [#allocation3], 64  }
   0xa   :  { %153 = vsyncadd [#allocation3], 4294967232 }
   0xb   :  { %38 = sfence }
   0xc   :  { %s40_s18 = sld [smem:[#allocation2]]  ;;  %v39_v0 = vld [vmem:[#allocation6] sm:$0xf]  ;;  %s158_s1 = smov [#allocation7]   ;;  %vm64_vm0 = vcmask 40960  }
   0xd   :  { %s84_s19 = sld [smem:[#allocation2 + $0x1]]  ;;  %s71_s21 = sshll.u32 %s158_s1, 4  ;;  %s72_s21 = int_to_ptr.vmem [resolvable:$true] %s71_s21 }
   0xe   :  { %s85_s0 = sld [smem:[#allocation2 + $0x2]]  ;;  %s73_s24 = sshll.u32 %s185_s2, 4  ;;  %s74_s24 = int_to_ptr.hbm [resolvable:$true] %s73_s24 }
   0xf   :  { %s86_s20 = sld [smem:[#allocation2 + $0x3]] }
  0x12   :  { %v41_v1 = vstv %s40_s18 }
  0x13   :  { %v44_v2 = vstv %s84_s19  ;;  %v42_v6 = vmul.f32 %v41_v1, %v39_v0 }
  0x14   :  { %v45_v3 = vmul.f32 %v44_v2, %v39_v0  ;;  %v47_v4 = vstv %s85_s0 }
  0x15   :  { %v50_v5 = vstv %s86_s20  ;;  %v48_v7 = vmul.f32 %v47_v4, %v39_v0 }
  0x16   :  { %v51_v8 = vmul.f32 %v50_v5, %v39_v0  ;;  %v53_v9 = vrot.slane %v45_v3, 1 }
  0x18   :  { %v57_v10 = vrot.slane %v51_v8, 1  ;;  %v55_v11 = vadd.f32 %v53_v9, %v42_v6 }
  0x1a   :  { %v59_v12 = vadd.f32 %v57_v10, %v48_v7 }
  0x1c   :  { %v61_v13 = vrot.slane %v59_v12, 2 }
  0x1e   :  { %v63_v14 = vadd.f32 %v61_v13, %v55_v11 }
  0x20   :  { %65 = vst.msk [vmem:[#allocation7] sm:$0x1] %vm64_vm0, %v63_v14 }
  0x21   :  { %76 = dma.vmem_to_hbm [thread:$0]  %s72_s21, 16, %s74_s24, [#allocation4]  }
  0x22   :  { %154 = dma.done.wait [#allocation4], 16  }
  0x23   :  { %155 = vsyncadd [#allocation4], 4294967280 }
  0x24   :  { %81 = vsyncpa [#allocation3], 1 }
  0x25   :  { %82 = vsyncpa [#allocation4], 1 }
  0x26   :  { %83 = vsyncpa [#allocation5], 1 }

</bundles_post_ra>
